<compile_context>
chip_gen: v7x
topology: tpu7x:2x2x1
jax: 0.10.0
libtpu: 0.0.40
codegen_flags: <defaults>
</compile_context>

<pallas_src>
import jax
import jax.numpy as jnp
from jax.experimental import pallas as pl
from jax.experimental.pallas import tpu as pltpu


def _hnn_mlp_kernel(x_ref, w1_ref, b1_ref, w2t_ref, b2_ref, w3_ref, b3_ref, o_ref):
    """Fused 3-layer tanh MLP (output_dim=1) for one batch tile.

    x_ref : [tb, input_dim] f32   (batch-major, as stored in HBM)
    w1    : [input_dim, hidden] bf16,   b1 : [1, hidden] f32
    w2t   : [hidden, hidden] bf16 (=W2^T), b2 : [hidden, 1] f32
    w3    : [hidden, 1] f32 output column, b3 : [1, 1] f32
    o_ref : [1, tb] f32  (lane-dense Hamiltonian row)
    """
    # Layer 1 (batch-major): [tb, in] @ [in, hid] -> [tb, hid], f32 accumulation.
    a1 = jnp.dot(x_ref[...].astype(jnp.bfloat16), w1_ref[...],
                 preferred_element_type=jnp.float32) + b1_ref[...]
    # tanh in f32 (v5e-safe), single XLU transpose to feature-major, keep the
    # activation bf16 since it is the next MXU operand anyway.
    h1t = jnp.tanh(a1).T.astype(jnp.bfloat16)                     # [hid, tb]
    # Layer 2 (feature-major): [hid, hid] @ [hid, tb] -> [hid, tb].
    a2 = jnp.dot(w2t_ref[...], h1t,
                 preferred_element_type=jnp.float32) + b2_ref[...]
    h2 = jnp.tanh(a2)                                             # [hid, tb] f32
    # Output layer (output_dim=1): VPU multiply + sublane reduce -> [1, tb].
    # (K=32 -> N=1: not worth an MXU pass / result-FIFO pop.)
    H = jnp.sum(h2 * w3_ref[...], axis=0, keepdims=True) + b3_ref[...]
    o_ref[...] = H.astype(o_ref.dtype)


def hnn_forward(x, kernel_params, *, tb=1024):
    """HNN.forward(x): differentiable_model(x).squeeze(-1) -> shape [batch]."""
    w1, b1r, w2t, b2c, w3c, b3c = kernel_params
    B, input_dim = x.shape

    # Tile selection: multiple of 128 (lane-dense stores, (8,128) rule), big
    # enough to amortize per-grid-step overhead, but clamped so medium batches
    # still give >=2 grid steps (keeps both v7x TensorCores busy; harmless on
    # v5e/v6e).  Small batches -> one (partial) tile.
    half_batch_tiles = ((pl.cdiv(B, 2) + 127) // 128) * 128
    tb = max(128, min((tb // 128) * 128, half_batch_tiles))
    num_tiles = pl.cdiv(B, tb)
    b_pad = num_tiles * tb   # only the tiny output row is padded; x read as-is

    const = lambda a: pl.BlockSpec(a.shape, lambda i: (0,) * a.ndim)

    out = pl.pallas_call(
        _hnn_mlp_kernel,
        out_shape=jax.ShapeDtypeStruct((1, b_pad), jnp.float32),
        grid=(num_tiles,),
        in_specs=[
            # Batch tile; the last block may be partial (bounded DMA, garbage
            # rows stay in their own lanes and are sliced away below).
            pl.BlockSpec((tb, input_dim), lambda i: (i, 0)),
            const(w1), const(b1r),          # weights/biases: VMEM-resident,
            const(w2t), const(b2c),         # never re-DMA'd across tiles.
            const(w3c), const(b3c),
        ],
        out_specs=pl.BlockSpec((1, tb), lambda i: (0, i)),   # lane-dense row
        compiler_params=pltpu.CompilerParams(
            dimension_semantics=("parallel",),
        ),
    )(x, w1, b1r, w2t, b2c, w3c, b3c)

    # squeeze(-1) + drop output padding — glue, outside the kernel.
    return out[0, :B]


def init_params(key, input_dim, hidden_dim, output_dim=1):
    """nn.Linear-style params, stored as [in, out] weights and [1, out] biases."""
    k1, k2, k3, k4, k5, k6 = jax.random.split(key, 6)
    s1 = 1.0 / jnp.sqrt(input_dim)
    s2 = 1.0 / jnp.sqrt(hidden_dim)
    w1 = jax.random.uniform(k1, (input_dim, hidden_dim), jnp.float32, -s1, s1)
    b1 = jax.random.uniform(k2, (1, hidden_dim), jnp.float32, -s1, s1)
    w2 = jax.random.uniform(k3, (hidden_dim, hidden_dim), jnp.float32, -s2, s2)
    b2 = jax.random.uniform(k4, (1, hidden_dim), jnp.float32, -s2, s2)
    w3 = jax.random.uniform(k5, (hidden_dim, output_dim), jnp.float32, -s2, s2)
    b3 = jax.random.uniform(k6, (1, output_dim), jnp.float32, -s2, s2)
    return (w1, b1, w2, b2, w3, b3)


def pack_params(params):
    """Repack nn.Linear params into the layout the kernel uses (setup-time only).

    w1 stays [in, hid] (layer 1 is batch-major) but cast to bf16; W2 becomes
    its transpose [hid, hid] bf16 (layer 2 runs feature-major); b2 becomes a
    [hid, 1] column; the output layer stays an f32 column.
    """
    w1, b1, w2, b2, w3, b3 = params
    return (
        w1.astype(jnp.bfloat16), b1,          # [in, hid] bf16, [1, hid] f32
        w2.T.astype(jnp.bfloat16), b2.T,      # [hid, hid] bf16, [hid, 1] f32
        w3,                                   # [hid, 1] f32 output column
        b3,                                   # [1, 1] f32
    )


def hnn_forward_ref(x, params):
    """Pure-JAX reference with matching bf16 MXU operands / f32 accumulation."""
    w1, b1, w2, b2, w3, b3 = params
    h = jnp.tanh(
        jnp.dot(x.astype(jnp.bfloat16), w1.astype(jnp.bfloat16),
                preferred_element_type=jnp.float32) + b1)
    h = jnp.tanh(
        jnp.dot(h.astype(jnp.bfloat16), w2.astype(jnp.bfloat16),
                preferred_element_type=jnp.float32) + b2)
    return (jnp.dot(h, w3) + b3)[:, 0]


if __name__ == "__main__":
    # TODO(synk): HNN.derivative (symplectic gradient J^{-1}·grad H) requires
    # autodiff of H w.r.t. x; only forward() is implemented per the module's
    # forward-pass semantics.
    batch, input_dim, hidden_dim = 8, 4, 32

    key = jax.random.PRNGKey(0)
    kx, kp = jax.random.split(key)
    x = jax.random.normal(kx, (batch, input_dim), jnp.float32)
    params = init_params(kp, input_dim, hidden_dim)
    kernel_params = pack_params(params)

    H = hnn_forward(x, kernel_params)
    jax.block_until_ready(H)

    H_ref = hnn_forward_ref(x, params)
    assert H.shape == (batch,), H.shape
    assert jnp.allclose(H, H_ref, atol=1e-4, rtol=1e-3), (H, H_ref)

    print("KERNEL_OK")
</pallas_src>

<mosaic_0001>
module attributes {stable_mosaic.version = 11 : i64} {
  func.func @_hnn_mlp_kernel(%arg0: i32, %arg1: memref<128x4xf32, #tpu.memory_space<vmem>>, %arg2: memref<4x32xbf16, #tpu.memory_space<vmem>>, %arg3: memref<1x32xf32, #tpu.memory_space<vmem>>, %arg4: memref<32x32xbf16, #tpu.memory_space<vmem>>, %arg5: memref<32x1xf32, #tpu.memory_space<vmem>>, %arg6: memref<32x1xf32, #tpu.memory_space<vmem>>, %arg7: memref<1x1xf32, #tpu.memory_space<vmem>>, %arg8: memref<1x128xf32, #tpu.memory_space<vmem>>) attributes {dimension_semantics = [#tpu.dimension_semantics<parallel>], iteration_bounds = array<i64: 1>, scalar_prefetch = 0 : i64, scratch_operands = 0 : i64, tpu.core_type = #tpu.core_type<tc>, window_params = [{transform_indices = @transform_0, window_bounds = array<i64: 128, 4>}, {pipeline_mode = #tpu.pipeline_mode<synchronous>, transform_indices = @transform_1, window_bounds = array<i64: 4, 32>}, {pipeline_mode = #tpu.pipeline_mode<synchronous>, transform_indices = @transform_2, window_bounds = array<i64: 1, 32>}, {pipeline_mode = #tpu.pipeline_mode<synchronous>, transform_indices = @transform_3, window_bounds = array<i64: 32, 32>}, {pipeline_mode = #tpu.pipeline_mode<synchronous>, transform_indices = @transform_4, window_bounds = array<i64: 32, 1>}, {pipeline_mode = #tpu.pipeline_mode<synchronous>, transform_indices = @transform_5, window_bounds = array<i64: 32, 1>}, {pipeline_mode = #tpu.pipeline_mode<synchronous>, transform_indices = @transform_6, window_bounds = array<i64: 1, 1>}, {transform_indices = @transform_7, window_bounds = array<i64: 1, 128>}]} {
    %c0 = arith.constant 0 : index
    %c0_0 = arith.constant 0 : index
    %0 = vector.load %arg1[%c0, %c0_0] : memref<128x4xf32, #tpu.memory_space<vmem>>, vector<128x4xf32>
    %1 = arith.truncf %0 : vector<128x4xf32> to vector<128x4xbf16>
    %c0_1 = arith.constant 0 : index
    %c0_2 = arith.constant 0 : index
    %2 = vector.load %arg2[%c0_1, %c0_2] : memref<4x32xbf16, #tpu.memory_space<vmem>>, vector<4x32xbf16>
    %cst = arith.constant dense<0.000000e+00> : vector<128x32xf32>
    %3 = tpu.matmul %1, %2, %cst {dimension_numbers = #tpu.dot_dimension_numbers<[1], [0], [0], [1], [0, 0, 1, 1], [], []>} : vector<128x4xbf16>, vector<4x32xbf16>, vector<128x32xf32> -> vector<128x32xf32>
    %c0_3 = arith.constant 0 : index
    %c0_4 = arith.constant 0 : index
    %4 = vector.load %arg3[%c0_3, %c0_4] : memref<1x32xf32, #tpu.memory_space<vmem>>, vector<1x32xf32>
    %5 = vector.broadcast %4 : vector<1x32xf32> to vector<128x32xf32>
    %6 = arith.addf %3, %5 : vector<128x32xf32>
    %7 = math.tanh %6 : vector<128x32xf32>
    %8 = tpu.transpose %7, [1, 0] : vector<128x32xf32> -> vector<32x128xf32>
    %9 = arith.truncf %8 : vector<32x128xf32> to vector<32x128xbf16>
    %c0_5 = arith.constant 0 : index
    %c0_6 = arith.constant 0 : index
    %10 = vector.load %arg4[%c0_5, %c0_6] : memref<32x32xbf16, #tpu.memory_space<vmem>>, vector<32x32xbf16>
    %cst_7 = arith.constant dense<0.000000e+00> : vector<32x128xf32>
    %11 = tpu.matmul %10, %9, %cst_7 {dimension_numbers = #tpu.dot_dimension_numbers<[1], [0], [0], [1], [0, 0, 1, 1], [], []>} : vector<32x32xbf16>, vector<32x128xbf16>, vector<32x128xf32> -> vector<32x128xf32>
    %c0_8 = arith.constant 0 : index
    %c0_9 = arith.constant 0 : index
    %12 = vector.load %arg5[%c0_8, %c0_9] : memref<32x1xf32, #tpu.memory_space<vmem>>, vector<32x1xf32>
    %13 = vector.broadcast %12 : vector<32x1xf32> to vector<32x128xf32>
    %14 = arith.addf %11, %13 : vector<32x128xf32>
    %15 = math.tanh %14 : vector<32x128xf32>
    %c0_10 = arith.constant 0 : index
    %c0_11 = arith.constant 0 : index
    %16 = vector.load %arg6[%c0_10, %c0_11] : memref<32x1xf32, #tpu.memory_space<vmem>>, vector<32x1xf32>
    %17 = vector.broadcast %16 : vector<32x1xf32> to vector<32x128xf32>
    %18 = arith.mulf %15, %17 : vector<32x128xf32>
    %cst_12 = arith.constant dense<0.000000e+00> : vector<128xf32>
    %19 = vector.multi_reduction <add>, %18, %cst_12 [0] : vector<32x128xf32> to vector<128xf32>
    %20 = vector.shape_cast %19 : vector<128xf32> to vector<1x128xf32>
    %c0_13 = arith.constant 0 : index
    %c0_14 = arith.constant 0 : index
    %21 = vector.load %arg7[%c0_13, %c0_14] : memref<1x1xf32, #tpu.memory_space<vmem>>, vector<1x1xf32>
    %22 = vector.broadcast %21 : vector<1x1xf32> to vector<1x128xf32>
    %23 = arith.addf %20, %22 : vector<1x128xf32>
    %c0_15 = arith.constant 0 : index
    %c0_16 = arith.constant 0 : index
    %24 = vector.load %arg8[%c0_15, %c0_16] : memref<1x128xf32, #tpu.memory_space<vmem>>, vector<1x128xf32>
    tpu.vector_store %arg8[%c0_15, %c0_16], %23 {strides = array<i32>} : memref<1x128xf32, #tpu.memory_space<vmem>>, vector<1x128xf32>,
    return
  }
  func.func @transform_0(%arg0: i32) -> (i32, i32) {
    %c0_i32 = arith.constant 0 : i32
    %c0_i32_0 = arith.constant 0 : i32
    return %arg0, %c0_i32 : i32, i32
  }
  func.func @transform_1(%arg0: i32) -> (i32, i32) {
    %c0_i32 = arith.constant 0 : i32
    %c0_i32_0 = arith.constant 0 : i32
    %c0_i32_1 = arith.constant 0 : i32
    return %c0_i32, %c0_i32_0 : i32, i32
  }
  func.func @transform_2(%arg0: i32) -> (i32, i32) {
    %c0_i32 = arith.constant 0 : i32
    %c0_i32_0 = arith.constant 0 : i32
    %c0_i32_1 = arith.constant 0 : i32
    return %c0_i32, %c0_i32_0 : i32, i32
  }
  func.func @transform_3(%arg0: i32) -> (i32, i32) {
    %c0_i32 = arith.constant 0 : i32
    %c0_i32_0 = arith.constant 0 : i32
    %c0_i32_1 = arith.constant 0 : i32
    return %c0_i32, %c0_i32_0 : i32, i32
  }
  func.func @transform_4(%arg0: i32) -> (i32, i32) {
    %c0_i32 = arith.constant 0 : i32
    %c0_i32_0 = arith.constant 0 : i32
    %c0_i32_1 = arith.constant 0 : i32
    return %c0_i32, %c0_i32_0 : i32, i32
  }
  func.func @transform_5(%arg0: i32) -> (i32, i32) {
    %c0_i32 = arith.constant 0 : i32
    %c0_i32_0 = arith.constant 0 : i32
    %c0_i32_1 = arith.constant 0 : i32
    return %c0_i32, %c0_i32_0 : i32, i32
  }
  func.func @transform_6(%arg0: i32) -> (i32, i32) {
    %c0_i32 = arith.constant 0 : i32
    %c0_i32_0 = arith.constant 0 : i32
    %c0_i32_1 = arith.constant 0 : i32
    return %c0_i32, %c0_i32_0 : i32, i32
  }
  func.func @transform_7(%arg0: i32) -> (i32, i32) {
    %c0_i32 = arith.constant 0 : i32
    %c0_i32_0 = arith.constant 0 : i32
    return %c0_i32, %arg0 : i32, i32
  }
}

</mosaic_0001>

<bundles_post_ra>
// kernel: tpu_custom_call.1
= control target key start
LH: loop header
LB: loop body
LE: loop exit
PB: predicated region body
PF: predicated region fallthrough
CT: control target
= control target key end

     0   :  { %s703_s0 = inlined_call_operand.vmem [shape: f32[8,4], index: 0, kind: input, shape index: {}]   ;;  %s704_s1 = inlined_call_operand.vmem [shape: bf16[4,32], index: 1, kind: input, shape index: {}]   ;;  %s705_s2 = inlined_call_operand.vmem [shape: f32[1,32], index: 2, kind: input, shape index: {}]   ;;  %s706_s3 = inlined_call_operand.vmem [shape: bf16[32,32], index: 3, kind: input, shape index: {}]   ;;  %s707_s4 = inlined_call_operand.vmem [shape: f32[32,1], index: 4, kind: input, shape index: {}]   ;;  %s708_s5 = inlined_call_operand.vmem [shape: f32[32,1], index: 5, kind: input, shape index: {}]   ;;  %s709_s6 = inlined_call_operand.<no memory space> [shape: f32[1,1], index: 6, kind: input, shape index: {}]   ;;  %s710_s7 = inlined_call_operand.hbm [shape: f32[1,128], index: 7, kind: output, shape index: {}]  }
   0x1   :  { %v12_v0 = vstv %s709_s6 }
   0x2   :  { %13 = vst [vmem:[#allocation2] sm:$0x1] %v12_v0 }
   0x3   :  { %v54_v1 = vld [vmem:[%s704_s1] sm:$0x3]  ;;  %vm87_vm0 = vcmask 1041408   ;;  %v31_v3 = vld [vmem:[%s703_s0 + $0x8] sm:$0xff]  ;;  %vm62_vm1 = vcmask 31744   ;;  %v32_v6 = vld [vmem:[%s703_s0 + $0x10] sm:$0xff] }
   0x4   :  { %v30_v2 = vld [vmem:[%s703_s0] sm:$0xff]  ;;  %453 = vmatprep.subr.msk.bf16.mxu0 %vm87_vm0, %v54_v1  ;;  %v89_v4 = vsel %vm87_vm0, %v54_v1, 0  ;;  %v33_v7 = vld [vmem:[%s703_s0 + $0x18] sm:$0xff]  ;;  %454 = vmatprep.subr.msk.bf16.mxu1 %vm87_vm0, %v54_v1  ;;  %v35_v10 = vld [vmem:[%s703_s0 + $0x28] sm:$0xff] }
   0x5   :  { %v46_v5 = vpack.c.bf16 %v31_v3, %v30_v2  ;;  %v34_v8 = vld [vmem:[%s703_s0 + $0x20] sm:$0xff]  ;;  %426 = vmatpush3.bf16.msra.mxu0 %v89_v4  ;;  %v47_v9 = vpack.c.bf16 %v33_v7, %v32_v6  ;;  %452 = vmatpush3.bf16.msra.mxu1 %v89_v4  ;;  %v36_v12 = vld [vmem:[%s703_s0 + $0x30] sm:$0xff]  ;;  %v37_v13 = vld [vmem:[%s703_s0 + $0x38] sm:$0xff] }
   0x6   :  { %v48_v11 = vpack.c.bf16 %v35_v10, %v34_v8  ;;  %v42_v14 = vld [vmem:[%s703_s0 + $0x60] sm:$0xff]  ;;  %v43_v15 = vld [vmem:[%s703_s0 + $0x68] sm:$0xff]  ;;  %v44_v17 = vld [vmem:[%s703_s0 + $0x70] sm:$0xff] }
   0x7   :  { %427 = vmatprep.mubr.msk.bf16.mxu0 %vm62_vm1, %v46_v5  ;;  %v52_v16 = vpack.c.bf16 %v43_v15, %v42_v14  ;;  %v45_v18 = vld [vmem:[%s703_s0 + $0x78] sm:$0xff]  ;;  %v38_v20 = vld [vmem:[%s703_s0 + $0x40] sm:$0xff]  ;;  %v39_v21 = vld [vmem:[%s703_s0 + $0x48] sm:$0xff] }
   0x8   :  { %428 = vmatmul.mubr.msk.bf16.vlgmr.msra.gmra.mrb[0].mxu0 %vm62_vm1, %v47_v9  ;;  %v53_v19 = vpack.c.bf16 %v45_v18, %v44_v17 }
   0x9   :  { %431 = vmatprep.mubr.msk.bf16.mxu0 %vm62_vm1, %v48_v11  ;;  %439 = vmatprep.mubr.msk.bf16.mxu1 %vm62_vm1, %v52_v16 }
   0xa   :  { %14 = vsyncpa [#allocation4], 0  ;;  %440 = vmatmul.mubr.msk.bf16.vlgmr.msra.gmra.mrb[0].mxu1 %vm62_vm1, %v53_v19  ;;  %v49_v22 = vpack.c.bf16 %v37_v13, %v36_v12  ;;  %v50_v23 = vpack.c.bf16 %v39_v21, %v38_v20  ;;  %v40_v24 = vld [vmem:[%s703_s0 + $0x50] sm:$0xff]  ;;  %v41_v25 = vld [vmem:[%s703_s0 + $0x58] sm:$0xff]  ;;  %vm276_vm2 = vcmask 261120   ;;  %v525_v61 = vmov 0  }
   0xb   :  { %v51_v26 = vpack.c.bf16 %v41_v25, %v40_v24  ;;  %v632_v27 = vld [vmem:[%s705_s2] ss:$0 sm:$0xff]  ;;  %457 = vset.pattern.permute.xlu1 %v525_v61  ;;  %v243_v63 = vld [vmem:[%s707_s4 + $0x8] sm:$0xff]  ;;  %v244_v2 = vld [vmem:[%s707_s4 + $0x10] sm:$0xff] }
   0xc   :  { %v459_v58 = vld [vmem:[%s706_s3] sm:$0xff]   ;;  %v245_v6 = vld [vmem:[%s707_s4 + $0x18] sm:$0xff]  ;;  %v337_v11 = vld [vmem:[%s708_s5 + $0x8] sm:$0xff] }
   0xd   :  { %447 = vmatprep.mubr.msk.bf16.mxu1 %vm276_vm2, %v459_v58  ;;  %v242_v60 = vld [vmem:[%s707_s4] sm:$0xff]  ;;  %v338_v14 = vld [vmem:[%s708_s5 + $0x10] sm:$0xff]  ;;  %v339_v18 = vld [vmem:[%s708_s5 + $0x18] sm:$0xff] }
   0xe   :  { %248 = vperm.xlu1 %457, %v242_v60   ;;  %v336_v8 = vld [vmem:[%s708_s5] sm:$0xff] }
   0xf   :  { %v373_v19 = vld [vmem:[#allocation2] sm:$0x1] }
  0x10   :  { %432 = vmatmul.mubr.msk.bf16.gmra.mrb[4].mxu0 %vm62_vm1, %v49_v22 }
  0x11   :  { %435 = vmatprep.mubr.msk.bf16.mxu0 %vm62_vm1, %v50_v23 }
  0x12   :  { %253 = vperm.xlu1 %457, %v243_v63  }
  0x16   :  { %258 = vperm.xlu1 %457, %v244_v2  }
  0x18   :  { %436 = vmatmul.mubr.msk.bf16.gmra.mrb[8].mxu0 %vm62_vm1, %v51_v26 }
  0x1a   :  { %263 = vperm.xlu1 %457, %v245_v6  }
  0x1e   :  { %342 = vperm.xlu1 %457, %v336_v8  }
  0x22   :  { %347 = vperm.xlu1 %457, %v337_v11  }
  0x26   :  { %352 = vperm.xlu1 %457, %v338_v14  }
  0x2a   :  { %357 = vperm.xlu1 %457, %v339_v18  }
  0x2e   :  { %376 = vperm.xlu1 %457, %v373_v19  }
  0xdb   :  { %v429_v28 = vpop.f32.mrb[0].mxu0 }
  0xdc   :  { %v125_v29 = vpop.f32.mrb[1].mxu0  ;;  %v134_v38 = vadd.f32 %v429_v28, %v632_v27 }
  0xdd   :  { %v126_v30 = vadd.f32 %v632_v27, %v125_v29  ;;  %v430_v31 = vpop.f32.mrb[2].mxu0  ;;  %v635_v33 = vpop.f32.mrb[0].mxu1  ;;  %v460_v29 = vld [vmem:[%s706_s3 + $0x8] sm:$0xff]   ;;  %s526_s3 = smov [#allocation3]  }
  0xde   :  { %v128_v32 = vpop.f32.mrb[3].mxu0  ;;  %v173_v35 = vpop.f32.mrb[1].mxu1  ;;  %v137_v43 = vadd.f32 %v430_v31, %v632_v27  ;;  %v182_v13 = vadd.f32 %v635_v33, %v632_v27  ;;  %s391_s28 = sshll.u32 %s526_s3, 4  ;;  %s392_s28 = int_to_ptr.vmem [resolvable:$true] %s391_s28 }
  0xdf   :  { %461 = vtanh.f32 %v126_v30  ;;  %v129_v34 = vadd.f32 %v632_v27, %v128_v32  ;;  %v638_v36 = vpop.f32.mrb[2].mxu1  ;;  %v174_v7 = vadd.f32 %v632_v27, %v173_v35  ;;  %v249_v30 = vpop.permute.xlu1 %248  ;;  %s501_s29 = scalar_lea.vmem %s392_s28, 16  ;;  %s505_s30 = scalar_lea.vmem %s392_s28, 32 }
  0xe0   :  { %v640_v37 = vpop.f32.mrb[3].mxu1  ;;  %v185_v17 = vadd.f32 %v638_v36, %v632_v27  ;;  %p502_p0 = scmp.ne.s32.totalorder %s392_s28, %s501_s29  ;;  %p506_p1 = scmp.lt.s32.totalorder %s392_s28, %s392_s28 }
  0xe1   :  { %463 = vtanh.f32 %v129_v34  ;;  %v177_v10 = vadd.f32 %v632_v27, %v640_v37  ;;  %p507_p2 = scmp.lt.s32.totalorder %s505_s30, %s501_s29 }
  0xe2   :  { %465 = vtanh.f32 %v134_v38 }
  0xe3   :  { %v433_v39 = vpop.f32.mrb[4].mxu0  ;;  %467 = vtanh.f32 %v137_v43  ;;  %v254_v31 = vpop.permute.xlu1 %253  ;;  %p508_p3 = por %p507_p2, %p506_p1 }
  0xe4   :  { %v141_v40 = vpop.f32.mrb[5].mxu0  ;;  %v150_v53 = vadd.f32 %v433_v39, %v632_v27 }
  0xe5   :  { %v434_v41 = vpop.f32.mrb[6].mxu0  ;;  %v142_v45 = vadd.f32 %v632_v27, %v141_v40  ;;  %p509_p4 = pnand %p508_p3, %p502_p0 }
  0xe6   :  { %v144_v42 = vpop.f32.mrb[7].mxu0  ;;  %v153_v56 = vadd.f32 %v434_v41, %v632_v27 }
  0xe7   :  { %469 = vtanh.f32 %v142_v45  ;;  %v145_v51 = vadd.f32 %v632_v27, %v144_v42  ;;  %v259_v32 = vpop.permute.xlu1 %258 }
  0xe9   :  { %v462_v44 = vpop.eup %461  ;;  %471 = vtanh.f32 %v145_v51 }
  0xea   :  { %204 = vxpose.xlu0.b32.start [1/16] (narrow) %v462_v44, 32  ;;  %473 = vtanh.f32 %v150_v53 }
  0xeb   :  { %v437_v46 = vpop.f32.mrb[8].mxu0  ;;  %v464_v48 = vpop.eup %463  ;;  %475 = vtanh.f32 %v153_v56  ;;  %v379_v56 = vlaneseq }
  0xec   :  { %v157_v47 = vpop.f32.mrb[9].mxu0  ;;  %v466_v52 = vpop.eup %465  ;;  %v166_v1 = vadd.f32 %v437_v46, %v632_v27 }
  0xed   :  { %v438_v49 = vpop.f32.mrb[10].mxu0  ;;  %v468_v54 = vpop.eup %467  ;;  %v158_v57 = vadd.f32 %v632_v27, %v157_v47 }
  0xee   :  { %205 = vxpose.xlu0.b32.cont [2/16] (narrow) %v464_v48, 32  ;;  %v160_v50 = vpop.f32.mrb[11].mxu0  ;;  %v169_v5 = vadd.f32 %v438_v49, %v632_v27  ;;  %v264_v33 = vpop.permute.xlu1 %263 }
  0xef   :  { %477 = vtanh.f32 %v158_v57  ;;  %v161_v62 = vadd.f32 %v632_v27, %v160_v50 }
  0xf1   :  { %v470_v55 = vpop.eup %469  ;;  %479 = vtanh.f32 %v161_v62 }
  0xf2   :  { %206 = vxpose.xlu0.b32.cont [3/16] (narrow) %v466_v52, 32  ;;  %481 = vtanh.f32 %v166_v1  ;;  %v343_v37 = vpop.permute.xlu1 %342 }
  0xf3   :  { %v472_v59 = vpop.eup %471  ;;  %483 = vtanh.f32 %v169_v5 }
  0xf4   :  { %v474_v0 = vpop.eup %473  ;;  %485 = vtanh.f32 %v174_v7 }
  0xf5   :  { %v476_v3 = vpop.eup %475  ;;  %487 = vtanh.f32 %v177_v10 }
  0xf6   :  { %207 = vxpose.xlu0.b32.cont [4/16] (narrow) %v468_v54, 32  ;;  %489 = vtanh.f32 %v182_v13  ;;  %v348_v43 = vpop.permute.xlu1 %347 }
  0xf7   :  { %491 = vtanh.f32 %v185_v17 }
  0xf9   :  { %v478_v4 = vpop.eup %477 }
  0xfa   :  { %208 = vxpose.xlu0.b32.cont [5/16] (narrow) %v470_v55, 32  ;;  %v353_v45 = vpop.permute.xlu1 %352 }
  0xfb   :  { %v480_v9 = vpop.eup %479 }
  0xfc   :  { %v482_v12 = vpop.eup %481 }
  0xfd   :  { %v484_v15 = vpop.eup %483 }
  0xfe   :  { %209 = vxpose.xlu0.b32.cont [6/16] (narrow) %v472_v59, 32  ;;  %v486_v16 = vpop.eup %485  ;;  %v358_v53 = vpop.permute.xlu1 %357  ;;  %v380_v59 = vshrl.u32 %v379_v56, 7 }
  0xff   :  { %v488_v20 = vpop.eup %487 }
 0x100   :  { %v490_v21 = vpop.eup %489  ;;  %v381_v62 = vsub.s32 0, %v380_v59 }
 0x101   :  { %v492_v22 = vpop.eup %491 }
 0x102   :  { %210 = vxpose.xlu0.b32.cont [7/16] (narrow) %v474_v0, 32  ;;  %v377_v0 = vpop.permute.xlu1 %376 }
 0x103   :  { %v382_v2 = vrot.slane %v377_v0, %v381_v62 }
 0x106   :  { %211 = vxpose.xlu0.b32.cont [8/16] (narrow) %v476_v3, 32 }
 0x10a   :  { %212 = vxpose.xlu0.b32.cont [9/16] (narrow) %v478_v4, 32 }
 0x10e   :  { %213 = vxpose.xlu0.b32.cont [10/16] (narrow) %v480_v9, 32 }
 0x112   :  { %214 = vxpose.xlu0.b32.cont [11/16] (narrow) %v482_v12, 32 }
 0x116   :  { %215 = vxpose.xlu0.b32.cont [12/16] (narrow) %v484_v15, 32 }
 0x11a   :  { %216 = vxpose.xlu0.b32.cont [13/16] (narrow) %v486_v16, 32 }
 0x11e   :  { %217 = vxpose.xlu0.b32.cont [14/16] (narrow) %v488_v20, 32 }
 0x122   :  { %218 = vxpose.xlu0.b32.cont [15/16] (narrow) %v490_v21, 32 }
 0x126   :  { %219 = vxpose.xlu0.b32.end [16/16] (narrow) %v492_v22, 32 }
 0x14f   :  { %458 = vset.pattern.permute.xlu0 %v525_v61 }
 0x16a   :  { %v220_v23 = vpop.trf.xlu0 }
 0x16e   :  { %v221_v24 = vpop.trf.xlu0 }
 0x16f   :  { %v236_v25 = vpack.c.bf16 %v221_v24, %v220_v23 }
 0x171   :  { %443 = vmatprep.subr.bf16.mxu1 %v236_v25 }
 0x172   :  { %444 = vmatpush3.bf16.msra.mxu1 %v236_v25  ;;  %v222_v26 = vpop.trf.xlu0 }
 0x176   :  { %v223_v27 = vpop.trf.xlu0 }
 0x177   :  { %v237_v28 = vpack.c.bf16 %v223_v27, %v222_v26 }
 0x179   :  { %445 = vmatprep.subr.bf16.mxu1 %v237_v28 }
 0x17a   :  { %446 = vmatpush3.bf16.msra.mxu1 %v237_v28 }
 0x17d   :  { %448 = vmatmul.mubr.msk.bf16.vlgmr.msra.gmra.mrb[4].mxu1 %vm276_vm2, %v460_v29 }
 0x250   :  { %v449_v34 = vpop.f32.mrb[4].mxu1 }
 0x251   :  { %v326_v35 = vadd.f32 %v449_v34, %v259_v32  ;;  %v317_v36 = vpop.f32.mrb[5].mxu1 }
 0x252   :  { %v318_v38 = vadd.f32 %v317_v36, %v249_v30  ;;  %v450_v39 = vpop.f32.mrb[6].mxu1 }
 0x253   :  { %v320_v40 = vpop.f32.mrb[7].mxu1  ;;  %v329_v41 = vadd.f32 %v450_v39, %v264_v33 }
 0x254   :  { %493 = vtanh.f32 %v318_v38  ;;  %v321_v42 = vadd.f32 %v320_v40, %v254_v31 }
 0x255   :  { %495 = vtanh.f32 %v326_v35 }
 0x256   :  { %497 = vtanh.f32 %v321_v42 }
 0x257   :  { %499 = vtanh.f32 %v329_v41 }
 0x25e   :  { %v494_v44 = vpop.eup %493 }
 0x25f   :  { %v496_v46 = vpop.eup %495  ;;  %v360_v48 = vmul.f32 %v494_v44, %v343_v37 }
 0x260   :  { %v498_v47 = vpop.eup %497  ;;  %v362_v51 = vmul.f32 %v496_v46, %v353_v45 }
 0x261   :  { %v361_v49 = vmul.f32 %v498_v47, %v348_v43  ;;  %v500_v50 = vpop.eup %499 }
 0x262   :  { %v363_v54 = vmul.f32 %v500_v50, %v358_v53 }
 0x263   :  { %v364_v52 = vadd.f32 %v361_v49, %v360_v48 }
 0x265   :  { %v365_v55 = vadd.f32 %v364_v52, %v362_v51 }
 0x267   :  { %v366_v57 = vadd.f32 %v365_v55, %v363_v54 }
 0x269   :  { %v367_v58 = vrot.slane %v366_v57, 4 }
 0x26b   :  { %v368_v60 = vadd.f32 %v367_v58, %v366_v57 }
 0x26d   :  { %v369_v61 = vrot.slane %v368_v60, 2 }
 0x26f   :  { %v370_v63 = vadd.f32 %v369_v61, %v368_v60 }
 0x271   :  { %v371_v1 = vrot.slane %v370_v63, 1 }
 0x273   :  { %v372_v3 = vadd.f32 %v371_v1, %v370_v63 }
 0x275   :  { %v383_v4 = vadd.f32 %v382_v2, %v372_v3 }
 0x277   :  { %384 = vst [vmem:[#allocation3] sm:$0x1] %v383_v4 }
 0x278   :  { %512 = shalt.err (!%p509_p4)
}
 0x279   :  { %s513_s6 = scalar_lea.hbm %s710_s7, 16 }
 0x27a   :  { %p514_p5 = scmp.ne.s32.totalorder %s710_s7, %s513_s6  ;;  %p517_p6 = scmp.lt.u32.totalorder %s513_s6, %s710_s7 }
 0x27c   :  { %p519_p7 = pnand %p517_p6, %p514_p5 }
 0x27e   :  { %522 = shalt.err (!%p519_p7)
}
 0x27f   :  { %394 = dma.vmem_to_hbm [thread:$0]  %s392_s28, 16, %s710_s7, [#allocation4]  }
 0x280   :  { %523 = dma.done.wait [#allocation4], 16  }
 0x281   :  { %524 = vsyncadd [#allocation4], 4294967280 }
 0x282   :  { %398 = vsyncpa [#allocation4], 1 }

</bundles_post_ra>
